<compile_context>
chip_gen: v5e
topology: v5e:2x2
jax: 0.10.0
libtpu: 0.0.40
codegen_flags: <defaults>
</compile_context>

<pallas_src>
import jax
import jax.numpy as jnp
from jax.experimental import pallas as pl
from jax.experimental.pallas import tpu as pltpu


def _patch_embed_kernel(patches_ref, w_ref, pos_ref, cls_ref, out_ref):
    # patches_ref: (bb*NP, K) bf16  im2col rows for bb whole batch elements
    # w_ref:       (K, E)     bf16  reordered/flattened Conv1d weight (resident)
    # pos_ref:     (NP, E)    f32   positions[1:] + conv bias (resident)
    # cls_ref:     (1, E)     f32   cls_token + positions[0] (resident)
    # out_ref:     (bb, NP+1, E)    full output block (cls row + patch rows)
    bb, np1, e = out_ref.shape
    n_patch = np1 - 1

    # One tall MXU matmul per grid step, f32 accumulation.
    proj = jnp.dot(patches_ref[...], w_ref[...],
                   preferred_element_type=jnp.float32)            # (bb*NP, E)
    proj = proj.reshape(bb, n_patch, e) + pos_ref[...][None, :, :]  # f32 VPU add

    # Row 0 of every batch element: batch-independent cls row.
    out_ref[:, 0:1, :] = jnp.broadcast_to(
        cls_ref[...][None, :, :], (bb, 1, e)).astype(out_ref.dtype)
    # Rows 1..NP: projected patches (+ positions, bias already folded in).
    out_ref[:, 1:, :] = proj.astype(out_ref.dtype)


def _choose_batch_block(B, NP, target_rows=512):
    """Largest bb | B with bb*NP <= target_rows and bb*NP % 8 == 0 (sublanes).

    Falls back to bb = B (full-extent blocks are always layout-legal)."""
    best = None
    for bb in range(1, B + 1):
        if B % bb:
            continue
        if bb * NP > target_rows:
            break
        if (bb * NP) % 8 == 0:
            best = bb
    return best if best is not None else B


def patch_embedding(x, conv_w, conv_b, cls_token, positions, patch_size,
                    *, row_tile_target=512):
    """x: (B, L, C). conv_w: (E, C, P). Returns (B, NP + 1, E)."""
    B, L, C = x.shape
    E, Cw, P = conv_w.shape
    assert Cw == C and P == patch_size
    # TODO(synk): stride != patch_size (overlapping patches) not implemented;
    # the im2col-as-reshape trick requires non-overlapping patches.
    NP = L // patch_size
    K = C * patch_size

    # im2col without transposing activations: pure reshape, (p, c) order.
    patches = x[:, : NP * patch_size, :].reshape(B * NP, K)
    # Fold the layout reorder into the tiny weight: w2[p*C + c, e] = conv_w[e, c, p]
    w2 = jnp.transpose(conv_w, (0, 2, 1)).reshape(E, K).T                 # (K, E)

    # bf16 MXU operands (f32 accumulation via preferred_element_type).
    patches_bf16 = patches.astype(jnp.bfloat16)
    w2_bf16 = w2.astype(jnp.bfloat16)

    # Fold conv bias into the learned positions; cls row is batch-independent.
    pos_f32 = positions.astype(jnp.float32)
    pos_rest = pos_f32[1:] + conv_b.astype(jnp.float32)[None, :]          # (NP, E)
    cls_row = cls_token.reshape(1, E).astype(jnp.float32) + pos_f32[0:1]  # (1, E)

    bb = _choose_batch_block(B, NP, row_tile_target)
    TM = bb * NP

    # Explicit VMEM budget (matters on v7x: 64 MiB physical / 32 MiB scoped default).
    est_vmem = (2 * TM * K * 2                  # double-buffered bf16 patch tiles
                + K * E * 2                     # bf16 weight (resident)
                + NP * E * 4 + E * 4            # resident pos / cls tiles (f32)
                + 2 * bb * (NP + 1) * E * 4)    # double-buffered output tiles
    vmem_limit = int(min(max(4 * est_vmem, 16 * 1024 * 1024), 64 * 1024 * 1024))

    return pl.pallas_call(
        _patch_embed_kernel,
        out_shape=jax.ShapeDtypeStruct((B, NP + 1, E), x.dtype),
        grid=(B // bb,),
        in_specs=[
            pl.BlockSpec((TM, K), lambda i: (i, 0)),        # im2col row tile
            pl.BlockSpec((K, E), lambda i: (0, 0)),         # shared weight
            pl.BlockSpec((NP, E), lambda i: (0, 0)),        # shared pos + bias
            pl.BlockSpec((1, E), lambda i: (0, 0)),         # shared cls row
        ],
        out_specs=pl.BlockSpec((bb, NP + 1, E), lambda i: (i, 0, 0)),
        compiler_params=pltpu.CompilerParams(
            dimension_semantics=("parallel",),
            vmem_limit_bytes=vmem_limit,
        ),
    )(patches_bf16, w2_bf16, pos_rest, cls_row)


def _reference_forward(x, conv_w, conv_b, cls_token, positions, patch_size):
    """Pure-JAX (f32) reference matching the PyTorch forward exactly."""
    B = x.shape[0]
    x_ncw = jnp.transpose(x, (0, 2, 1))                          # b l c -> b c l
    y = jax.lax.conv_general_dilated(
        x_ncw, conv_w, window_strides=(patch_size,), padding="VALID",
        dimension_numbers=("NCH", "OIH", "NCH"))
    y = y + conv_b[None, :, None]
    y = jnp.transpose(y, (0, 2, 1))                              # b c l -> b l c
    cls = jnp.broadcast_to(cls_token, (B, 1, cls_token.shape[-1]))
    return jnp.concatenate([cls, y], axis=1) + positions[None]


def _run_case(key, B, L, C, E, P):
    NP = L // P
    kx, kw, kb, kc, kp = jax.random.split(key, 5)
    # TODO(synk): input_norm=True (BatchNorm1d) path not implemented; module
    # default is Identity, which is what we reproduce here.
    x = jax.random.normal(kx, (B, L, C), dtype=jnp.float32)
    conv_w = jax.random.normal(kw, (E, C, P), dtype=jnp.float32) * 0.05
    conv_b = jax.random.normal(kb, (E,), dtype=jnp.float32) * 0.05
    cls_token = jax.random.normal(kc, (1, 1, E), dtype=jnp.float32)
    positions = jax.random.normal(kp, (NP + 1, E), dtype=jnp.float32)

    out = patch_embedding(x, conv_w, conv_b, cls_token, positions, P)
    out = jax.block_until_ready(out)

    ref = _reference_forward(x, conv_w, conv_b, cls_token, positions, P)
    assert out.shape == (B, NP + 1, E), out.shape
    # bf16 MXU operands (f32 accumulation) -> loosened tolerance vs f32 reference.
    assert jnp.allclose(out, ref, atol=2e-2, rtol=2e-2), "mismatch vs reference"


if __name__ == "__main__":
    key = jax.random.PRNGKey(0)
    k1, k2 = jax.random.split(key)

    # Spec-like shapes (in_channels=2, input_length=512, E=128, patch_size=8):
    # M = B*NP = 1024, batch block bb=8 -> 2 parallel grid steps of 512 rows.
    _run_case(k1, B=16, L=512, C=2, E=128, P=8)

    # Small/odd shapes: B=2, NP=8 -> single grid step (full-extent blocks).
    _run_case(k2, B=2, L=64, C=4, E=128, P=8)

    print("KERNEL_OK")
</pallas_src>

<mosaic_0001>
module attributes {stable_mosaic.version = 11 : i64} {
  func.func @_patch_embed_kernel(%arg0: i32, %arg1: memref<512x16xbf16, #tpu.memory_space<vmem>>, %arg2: memref<16x128xbf16, #tpu.memory_space<vmem>>, %arg3: memref<64x128xf32, #tpu.memory_space<vmem>>, %arg4: memref<1x128xf32, #tpu.memory_space<vmem>>, %arg5: memref<8x65x128xf32, #tpu.memory_space<vmem>>) attributes {dimension_semantics = [#tpu.dimension_semantics<parallel>], iteration_bounds = array<i64: 2>, scalar_prefetch = 0 : i64, scratch_operands = 0 : i64, tpu.core_type = #tpu.core_type<tc>, window_params = [{transform_indices = @transform_0, window_bounds = array<i64: 512, 16>}, {pipeline_mode = #tpu.pipeline_mode<synchronous>, transform_indices = @transform_1, window_bounds = array<i64: 16, 128>}, {pipeline_mode = #tpu.pipeline_mode<synchronous>, transform_indices = @transform_2, window_bounds = array<i64: 64, 128>}, {pipeline_mode = #tpu.pipeline_mode<synchronous>, transform_indices = @transform_3, window_bounds = array<i64: 1, 128>}, {transform_indices = @transform_4, window_bounds = array<i64: 8, 65, 128>}]} {
    %c0 = arith.constant 0 : index
    %c0_0 = arith.constant 0 : index
    %0 = vector.load %arg1[%c0, %c0_0] : memref<512x16xbf16, #tpu.memory_space<vmem>>, vector<512x16xbf16>
    %c0_1 = arith.constant 0 : index
    %c0_2 = arith.constant 0 : index
    %1 = vector.load %arg2[%c0_1, %c0_2] : memref<16x128xbf16, #tpu.memory_space<vmem>>, vector<16x128xbf16>
    %cst = arith.constant dense<0.000000e+00> : vector<512x128xf32>
    %2 = tpu.matmul %0, %1, %cst {dimension_numbers = #tpu.dot_dimension_numbers<[1], [0], [0], [1], [0, 0, 1, 1], [], []>} : vector<512x16xbf16>, vector<16x128xbf16>, vector<512x128xf32> -> vector<512x128xf32>
    %3 = vector.shape_cast %2 : vector<512x128xf32> to vector<8x64x128xf32>
    %c0_3 = arith.constant 0 : index
    %c0_4 = arith.constant 0 : index
    %4 = vector.load %arg3[%c0_3, %c0_4] : memref<64x128xf32, #tpu.memory_space<vmem>>, vector<64x128xf32>
    %5 = vector.shape_cast %4 : vector<64x128xf32> to vector<1x64x128xf32>
    %6 = vector.broadcast %5 : vector<1x64x128xf32> to vector<8x64x128xf32>
    %7 = arith.addf %3, %6 : vector<8x64x128xf32>
    %c0_5 = arith.constant 0 : index
    %c0_6 = arith.constant 0 : index
    %8 = vector.load %arg4[%c0_5, %c0_6] : memref<1x128xf32, #tpu.memory_space<vmem>>, vector<1x128xf32>
    %9 = vector.shape_cast %8 : vector<1x128xf32> to vector<1x1x128xf32>
    %10 = vector.shape_cast %9 : vector<1x1x128xf32> to vector<1x1x128xf32>
    %11 = vector.broadcast %10 : vector<1x1x128xf32> to vector<8x1x128xf32>
    %c0_7 = arith.constant 0 : index
    %c0_8 = arith.constant 0 : index
    %c0_9 = arith.constant 0 : index
    %12 = vector.load %arg5[%c0_7, %c0_8, %c0_9] : memref<8x65x128xf32, #tpu.memory_space<vmem>>, vector<8x1x128xf32>
    tpu.vector_store %arg5[%c0_7, %c0_8, %c0_9], %11 {strides = array<i32>} : memref<8x65x128xf32, #tpu.memory_space<vmem>>, vector<8x1x128xf32>,
    %c0_10 = arith.constant 0 : index
    %c1 = arith.constant 1 : index
    %c0_11 = arith.constant 0 : index
    %13 = vector.load %arg5[%c0_10, %c1, %c0_11] : memref<8x65x128xf32, #tpu.memory_space<vmem>>, vector<8x64x128xf32>
    tpu.vector_store %arg5[%c0_10, %c1, %c0_11], %7 {strides = array<i32>} : memref<8x65x128xf32, #tpu.memory_space<vmem>>, vector<8x64x128xf32>,
    return
  }
  func.func @transform_0(%arg0: i32) -> (i32, i32) {
    %c0_i32 = arith.constant 0 : i32
    %c0_i32_0 = arith.constant 0 : i32
    return %arg0, %c0_i32 : i32, i32
  }
  func.func @transform_1(%arg0: i32) -> (i32, i32) {
    %c0_i32 = arith.constant 0 : i32
    %c0_i32_0 = arith.constant 0 : i32
    %c0_i32_1 = arith.constant 0 : i32
    return %c0_i32, %c0_i32_0 : i32, i32
  }
  func.func @transform_2(%arg0: i32) -> (i32, i32) {
    %c0_i32 = arith.constant 0 : i32
    %c0_i32_0 = arith.constant 0 : i32
    %c0_i32_1 = arith.constant 0 : i32
    return %c0_i32, %c0_i32_0 : i32, i32
  }
  func.func @transform_3(%arg0: i32) -> (i32, i32) {
    %c0_i32 = arith.constant 0 : i32
    %c0_i32_0 = arith.constant 0 : i32
    %c0_i32_1 = arith.constant 0 : i32
    return %c0_i32, %c0_i32_0 : i32, i32
  }
  func.func @transform_4(%arg0: i32) -> (i32, i32, i32) {
    %c0_i32 = arith.constant 0 : i32
    %c0_i32_0 = arith.constant 0 : i32
    %c0_i32_1 = arith.constant 0 : i32
    return %arg0, %c0_i32, %c0_i32_0 : i32, i32, i32
  }
}

</mosaic_0001>

<bundles_post_ra>
// kernel: tpu_custom_call.1
= control target key start
LH: loop header
LB: loop body
LE: loop exit
PB: predicated region body
PF: predicated region fallthrough
CT: control target
= control target key end

     0   :  { %s1158_s15 = smov 0   ;;  %s1429_s0 = inlined_call_operand.vmem [shape: bf16[1024,16], index: 0, kind: input, shape index: {}]   ;;  %s1430_s1 = inlined_call_operand.vmem [shape: bf16[16,128], index: 1, kind: input, shape index: {}]   ;;  %s1431_s2 = inlined_call_operand.vmem [shape: f32[64,128], index: 2, kind: input, shape index: {}]   ;;  %s1432_s3 = inlined_call_operand.vmem [shape: f32[1,128], index: 3, kind: input, shape index: {}]   ;;  %s1433_s4 = inlined_call_operand.vmem [shape: f32[16,65,128], index: 4, kind: output, shape index: {}]  }
   0x1 LB: > { %s905_s16 = sadd.s32 4294967295, %s1131_s15   ;;  %p909_p0 = scmp.ge.s32.totalorder %s1131_s15, 1  ;;  %s1131_s15 = sphi %s1158_s15, %s14_s15  }
   0x2   : > { %p163_p1 = scmp.lt.s32.totalorder %s1131_s15, 3 }
   0x4   : > { %p164_p2 = pnand %p909_p0, %p163_p1 }
   0x5   : > { %s910_s19 = sshll.u32 (!%p164_p2), %s905_s16, 6  ;;  %s912_s24 = sshll.u32 (!%p164_p2), %s905_s16, 3 }
   0x6   : > { %167 = sbr.rel (%p164_p2) target bundleno = 273 (0x111), region = 36  ;;  %p191_p3 = scmp.lt.s32.totalorder (!%p164_p2), %s910_s19, 127 }
   0x7   : > { %p197_p4 = scmp.lt.s32.totalorder (!%p164_p2), %s912_s24, 15 }
   0xb   : > { %v1112_v0 = vld [vmem:[%s1430_s1] sm:$0xff]  ;;  %s1435_s19 = smov (!%p191_p3, %s910_s19), 127  ;;  %vm436_vm0 = vcmask 130048   ;;  %s1437_s24 = smov (!%p197_p4, %s912_s24), 15  ;;  %v1259_v38 = vld [vmem:[%s1431_s2 + $0x8] sm:$0xff]  ;;  %v1272_v47 = vld [vmem:[%s1431_s2 + $0x10] sm:$0xff] }
   0xc   : > { %540 = vmatpush.bf16.msra.mxu0 %v1112_v0  ;;  %1113 = vmatpush.bf16.msra.mxu1 %v1112_v0  ;;  %s911_s20 = sshll.u32 %s1435_s19, 2  ;;  %s1116_s25 = smul.u32 72, %s1437_s24  ;;  %v1245_v33 = vld [vmem:[%s1431_s2] sm:$0xff]  ;;  %v1285_v56 = vld [vmem:[%s1431_s2 + $0x18] sm:$0xff] }
   0xd   : > { %1114 = vmatpush.bf16.msra.mxu2 %v1112_v0  ;;  %1115 = vmatpush.bf16.msra.mxu3 %v1112_v0  ;;  %s1174_s23 = scalar_lea.vmem %s1429_s0, %s911_s20 }
   0xe   : > { %v1080_v1 = vld [vmem:[%s1174_s23] sm:$0xff]  ;;  %v1081_v5 = vld [vmem:[%s1174_s23 + $0x8] sm:$0xff]  ;;  %v1082_v9 = vld [vmem:[%s1174_s23 + $0x10] sm:$0xff]  ;;  %s1250_s30 = scalar_lea.vmem %s1433_s4, %s1116_s25 }
   0xf   : > { %v1088_v2 = vld [vmem:[%s1174_s23 + $0x40] sm:$0xff]  ;;  %1046 = vmatmul.msk.bf16.vlgmr.msra.gmra.mxu0 %vm436_vm0, %v1080_v1  ;;  %v1089_v6 = vld [vmem:[%s1174_s23 + $0x48] sm:$0xff]  ;;  %v1090_v10 = vld [vmem:[%s1174_s23 + $0x50] sm:$0xff] }
  0x10   : > { %v1096_v3 = vld [vmem:[%s1174_s23 + $0x80] sm:$0xff]  ;;  %1054 = vmatmul.msk.bf16.vlgmr.msra.gmra.mxu1 %vm436_vm0, %v1088_v2  ;;  %v1097_v7 = vld [vmem:[%s1174_s23 + $0x88] sm:$0xff]  ;;  %v1098_v11 = vld [vmem:[%s1174_s23 + $0x90] sm:$0xff] }
  0x11   : > { %v1104_v4 = vld [vmem:[%s1174_s23 + $0xc0] sm:$0xff]  ;;  %1062 = vmatmul.msk.bf16.vlgmr.msra.gmra.mxu2 %vm436_vm0, %v1096_v3  ;;  %v1105_v8 = vld [vmem:[%s1174_s23 + $0xc8] sm:$0xff]  ;;  %v1106_v12 = vld [vmem:[%s1174_s23 + $0xd0] sm:$0xff] }
  0x12   : > { %1070 = vmatmul.msk.bf16.vlgmr.msra.gmra.mxu3 %vm436_vm0, %v1104_v4  ;;  %v1083_v13 = vld [vmem:[%s1174_s23 + $0x18] sm:$0xff]  ;;  %v1084_v17 = vld [vmem:[%s1174_s23 + $0x20] sm:$0xff]  ;;  %v1085_v21 = vld [vmem:[%s1174_s23 + $0x28] sm:$0xff] }
  0x13   : > { %v1091_v14 = vld [vmem:[%s1174_s23 + $0x58] sm:$0xff]  ;;  %v1092_v18 = vld [vmem:[%s1174_s23 + $0x60] sm:$0xff]  ;;  %v1093_v22 = vld [vmem:[%s1174_s23 + $0x68] sm:$0xff] }
  0x14   : > { %v1099_v15 = vld [vmem:[%s1174_s23 + $0x98] sm:$0xff]  ;;  %v1100_v19 = vld [vmem:[%s1174_s23 + $0xa0] sm:$0xff]  ;;  %v1101_v23 = vld [vmem:[%s1174_s23 + $0xa8] sm:$0xff] }
  0x15   : > { %v1107_v16 = vld [vmem:[%s1174_s23 + $0xd8] sm:$0xff]  ;;  %v1108_v20 = vld [vmem:[%s1174_s23 + $0xe0] sm:$0xff]  ;;  %v1109_v24 = vld [vmem:[%s1174_s23 + $0xe8] sm:$0xff] }
  0x16   : > { %v1086_v25 = vld [vmem:[%s1174_s23 + $0x30] sm:$0xff]  ;;  %v1087_v29 = vld [vmem:[%s1174_s23 + $0x38] sm:$0xff]  ;;  %v1298_v1 = vld [vmem:[%s1431_s2 + $0x20] sm:$0xff] }
  0x17   : > { %v1094_v26 = vld [vmem:[%s1174_s23 + $0x70] sm:$0xff]  ;;  %v1095_v30 = vld [vmem:[%s1174_s23 + $0x78] sm:$0xff] }
  0x18   : > { %v1102_v27 = vld [vmem:[%s1174_s23 + $0xb0] sm:$0xff]  ;;  %v1103_v31 = vld [vmem:[%s1174_s23 + $0xb8] sm:$0xff] }
  0x19   : > { %v1110_v28 = vld [vmem:[%s1174_s23 + $0xf0] sm:$0xff]  ;;  %v1111_v32 = vld [vmem:[%s1174_s23 + $0xf8] sm:$0xff] }
  0x1f   : > { %1047 = vmatmul.msk.bf16.gmra.mxu0 %vm436_vm0, %v1081_v5 }
  0x20   : > { %1055 = vmatmul.msk.bf16.gmra.mxu1 %vm436_vm0, %v1089_v6 }
  0x21   : > { %1063 = vmatmul.msk.bf16.gmra.mxu2 %vm436_vm0, %v1097_v7 }
  0x22   : > { %1071 = vmatmul.msk.bf16.gmra.mxu3 %vm436_vm0, %v1105_v8 }
  0x2f   : > { %1048 = vmatmul.msk.bf16.gmra.mxu0 %vm436_vm0, %v1082_v9 }
  0x30   : > { %1056 = vmatmul.msk.bf16.gmra.mxu1 %vm436_vm0, %v1090_v10  ;;  %v1311_v10 = vld [vmem:[%s1431_s2 + $0x28] sm:$0xff] }
  0x31   : > { %1064 = vmatmul.msk.bf16.gmra.mxu2 %vm436_vm0, %v1098_v11 }
  0x32   : > { %1072 = vmatmul.msk.bf16.gmra.mxu3 %vm436_vm0, %v1106_v12 }
  0x3f   : > { %1049 = vmatmul.msk.bf16.gmra.mxu0 %vm436_vm0, %v1083_v13 }
  0x40   : > { %1057 = vmatmul.msk.bf16.gmra.mxu1 %vm436_vm0, %v1091_v14 }
  0x41   : > { %1065 = vmatmul.msk.bf16.gmra.mxu2 %vm436_vm0, %v1099_v15 }
  0x42   : > { %1073 = vmatmul.msk.bf16.gmra.mxu3 %vm436_vm0, %v1107_v16 }
  0x4f   : > { %1050 = vmatmul.msk.bf16.gmra.mxu0 %vm436_vm0, %v1084_v17 }
  0x50   : > { %1058 = vmatmul.msk.bf16.gmra.mxu1 %vm436_vm0, %v1092_v18 }
  0x51   : > { %1066 = vmatmul.msk.bf16.gmra.mxu2 %vm436_vm0, %v1100_v19  ;;  %v1324_v19 = vld [vmem:[%s1431_s2 + $0x30] sm:$0xff] }
  0x52   : > { %1074 = vmatmul.msk.bf16.gmra.mxu3 %vm436_vm0, %v1108_v20 }
  0x5f   : > { %1051 = vmatmul.msk.bf16.gmra.mxu0 %vm436_vm0, %v1085_v21 }
  0x60   : > { %1059 = vmatmul.msk.bf16.gmra.mxu1 %vm436_vm0, %v1093_v22 }
  0x61   : > { %1067 = vmatmul.msk.bf16.gmra.mxu2 %vm436_vm0, %v1101_v23 }
  0x62   : > { %1075 = vmatmul.msk.bf16.gmra.mxu3 %vm436_vm0, %v1109_v24 }
  0x6f   : > { %1052 = vmatmul.msk.bf16.gmra.mxu0 %vm436_vm0, %v1086_v25 }
  0x70   : > { %1060 = vmatmul.msk.bf16.gmra.mxu1 %vm436_vm0, %v1094_v26 }
  0x71   : > { %1068 = vmatmul.msk.bf16.gmra.mxu2 %vm436_vm0, %v1102_v27 }
  0x72   : > { %1076 = vmatmul.msk.bf16.gmra.mxu3 %vm436_vm0, %v1110_v28  ;;  %v1337_v28 = vld [vmem:[%s1431_s2 + $0x38] sm:$0xff] }
  0x7f   : > { %1053 = vmatmul.msk.bf16.gmra.mxu0 %vm436_vm0, %v1087_v29 }
  0x80   : > { %1061 = vmatmul.msk.bf16.gmra.mxu1 %vm436_vm0, %v1095_v30 }
  0x81   : > { %1069 = vmatmul.msk.bf16.gmra.mxu2 %vm436_vm0, %v1103_v31 }
  0x82   : > { %1077 = vmatmul.msk.bf16.gmra.mxu3 %vm436_vm0, %v1111_v32 }
  0x8c   : > { %v542_v34 = vpop.f32.mrf.mxu0 }
  0x8d   : > { %v582_v35 = vpop.f32.mrf.mxu1  ;;  %v710_v36 = vadd.f32 %v1245_v33, %v542_v34 }
  0x8e   : > { %v726_v37 = vadd.f32 %v1245_v33, %v582_v35 }
  0x8f   : > { %783 = vst [vmem:[%s1250_s30 + $0x1] sm:$0xff] %v710_v36 }
  0x90   : > { %799 = vst [vmem:[%s1250_s30 + $0x91] sm:$0xff] %v726_v37 }
  0x94   : > { %v622_v39 = vpop.f32.mrf.mxu2  ;;  %v544_v43 = vpop.f32.mrf.mxu0 }
  0x95   : > { %v662_v40 = vpop.f32.mrf.mxu3  ;;  %v742_v41 = vadd.f32 %v1245_v33, %v622_v39  ;;  %v584_v44 = vpop.f32.mrf.mxu1  ;;  %v711_v45 = vadd.f32 %v1259_v38, %v544_v43 }
  0x96   : > { %v758_v42 = vadd.f32 %v1245_v33, %v662_v40  ;;  %v727_v46 = vadd.f32 %v1259_v38, %v584_v44 }
  0x97   : > { %815 = vst [vmem:[%s1250_s30 + $0x121] sm:$0xff] %v742_v41 }
  0x98   : > { %831 = vst [vmem:[%s1250_s30 + $0x1b1] sm:$0xff] %v758_v42 }
  0x99   : > { %784 = vst [vmem:[%s1250_s30 + $0x9] sm:$0xff] %v711_v45 }
  0x9a   : > { %800 = vst [vmem:[%s1250_s30 + $0x99] sm:$0xff] %v727_v46 }
  0x9c   : > { %v624_v48 = vpop.f32.mrf.mxu2  ;;  %v547_v52 = vpop.f32.mrf.mxu0 }
  0x9d   : > { %v664_v49 = vpop.f32.mrf.mxu3  ;;  %v743_v50 = vadd.f32 %v1259_v38, %v624_v48  ;;  %v587_v53 = vpop.f32.mrf.mxu1  ;;  %v712_v54 = vadd.f32 %v1272_v47, %v547_v52 }
  0x9e   : > { %v759_v51 = vadd.f32 %v1259_v38, %v664_v49  ;;  %v728_v55 = vadd.f32 %v1272_v47, %v587_v53 }
  0x9f   : > { %816 = vst [vmem:[%s1250_s30 + $0x129] sm:$0xff] %v743_v50 }
  0xa0   : > { %832 = vst [vmem:[%s1250_s30 + $0x1b9] sm:$0xff] %v759_v51 }
  0xa1   : > { %785 = vst [vmem:[%s1250_s30 + $0x11] sm:$0xff] %v712_v54 }
  0xa2   : > { %801 = vst [vmem:[%s1250_s30 + $0xa1] sm:$0xff] %v728_v55 }
  0xa4   : > { %v627_v57 = vpop.f32.mrf.mxu2  ;;  %v549_v61 = vpop.f32.mrf.mxu0 }
  0xa5   : > { %v667_v58 = vpop.f32.mrf.mxu3  ;;  %v744_v59 = vadd.f32 %v1272_v47, %v627_v57  ;;  %v589_v62 = vpop.f32.mrf.mxu1  ;;  %v713_v63 = vadd.f32 %v1285_v56, %v549_v61 }
  0xa6   : > { %v760_v60 = vadd.f32 %v1272_v47, %v667_v58  ;;  %v729_v0 = vadd.f32 %v1285_v56, %v589_v62 }
  0xa7   : > { %817 = vst [vmem:[%s1250_s30 + $0x131] sm:$0xff] %v744_v59 }
  0xa8   : > { %833 = vst [vmem:[%s1250_s30 + $0x1c1] sm:$0xff] %v760_v60 }
  0xa9   : > { %786 = vst [vmem:[%s1250_s30 + $0x19] sm:$0xff] %v713_v63 }
  0xaa   : > { %802 = vst [vmem:[%s1250_s30 + $0xa9] sm:$0xff] %v729_v0 }
  0xac   : > { %v629_v2 = vpop.f32.mrf.mxu2  ;;  %v552_v6 = vpop.f32.mrf.mxu0 }
  0xad   : > { %v669_v3 = vpop.f32.mrf.mxu3  ;;  %v745_v4 = vadd.f32 %v1285_v56, %v629_v2  ;;  %v592_v7 = vpop.f32.mrf.mxu1  ;;  %v714_v8 = vadd.f32 %v1298_v1, %v552_v6 }
  0xae   : > { %v761_v5 = vadd.f32 %v1285_v56, %v669_v3  ;;  %v730_v9 = vadd.f32 %v1298_v1, %v592_v7 }
  0xaf   : > { %818 = vst [vmem:[%s1250_s30 + $0x139] sm:$0xff] %v745_v4 }
  0xb0   : > { %834 = vst [vmem:[%s1250_s30 + $0x1c9] sm:$0xff] %v761_v5 }
  0xb1   : > { %787 = vst [vmem:[%s1250_s30 + $0x21] sm:$0xff] %v714_v8 }
  0xb2   : > { %803 = vst [vmem:[%s1250_s30 + $0xb1] sm:$0xff] %v730_v9 }
  0xb4   : > { %v632_v11 = vpop.f32.mrf.mxu2  ;;  %v554_v15 = vpop.f32.mrf.mxu0 }
  0xb5   : > { %v672_v12 = vpop.f32.mrf.mxu3  ;;  %v746_v13 = vadd.f32 %v1298_v1, %v632_v11  ;;  %v594_v16 = vpop.f32.mrf.mxu1  ;;  %v715_v17 = vadd.f32 %v1311_v10, %v554_v15 }
  0xb6   : > { %v762_v14 = vadd.f32 %v1298_v1, %v672_v12  ;;  %v731_v18 = vadd.f32 %v1311_v10, %v594_v16  ;;  %v774_v16 = vld [vmem:[%s1432_s3] sm:$0x1] }
  0xb7   : > { %819 = vst [vmem:[%s1250_s30 + $0x141] sm:$0xff] %v746_v13 }
  0xb8   : > { %835 = vst [vmem:[%s1250_s30 + $0x1d1] sm:$0xff] %v762_v14 }
  0xb9   : > { %788 = vst [vmem:[%s1250_s30 + $0x29] sm:$0xff] %v715_v17 }
  0xba   : > { %804 = vst [vmem:[%s1250_s30 + $0xb9] sm:$0xff] %v731_v18 }
  0xbb   : > { %775 = vst [vmem:[%s1250_s30] sm:$0x1] %v774_v16 }
  0xbc   : > { %v634_v20 = vpop.f32.mrf.mxu2  ;;  %v557_v24 = vpop.f32.mrf.mxu0  ;;  %776 = vst [vmem:[%s1250_s30 + $0x48] sm:$0x1] %v774_v16 }
  0xbd   : > { %v674_v21 = vpop.f32.mrf.mxu3  ;;  %v747_v22 = vadd.f32 %v1311_v10, %v634_v20  ;;  %v597_v25 = vpop.f32.mrf.mxu1  ;;  %v716_v26 = vadd.f32 %v1324_v19, %v557_v24  ;;  %777 = vst [vmem:[%s1250_s30 + $0x90] sm:$0x1] %v774_v16 }
  0xbe   : > { %v763_v23 = vadd.f32 %v1311_v10, %v674_v21  ;;  %v732_v27 = vadd.f32 %v1324_v19, %v597_v25  ;;  %778 = vst [vmem:[%s1250_s30 + $0xd8] sm:$0x1] %v774_v16 }
  0xbf   : > { %820 = vst [vmem:[%s1250_s30 + $0x149] sm:$0xff] %v747_v22 }
  0xc0   : > { %836 = vst [vmem:[%s1250_s30 + $0x1d9] sm:$0xff] %v763_v23 }
  0xc1   : > { %789 = vst [vmem:[%s1250_s30 + $0x31] sm:$0xff] %v716_v26 }
  0xc2   : > { %805 = vst [vmem:[%s1250_s30 + $0xc1] sm:$0xff] %v732_v27 }
  0xc3   : > { %779 = vst [vmem:[%s1250_s30 + $0x120] sm:$0x1] %v774_v16 }
  0xc4   : > { %v637_v29 = vpop.f32.mrf.mxu2  ;;  %v559_v34 = vpop.f32.mrf.mxu0  ;;  %780 = vst [vmem:[%s1250_s30 + $0x168] sm:$0x1] %v774_v16 }
  0xc5   : > { %v677_v30 = vpop.f32.mrf.mxu3  ;;  %v748_v31 = vadd.f32 %v1324_v19, %v637_v29  ;;  %v599_v35 = vpop.f32.mrf.mxu1  ;;  %v717_v36 = vadd.f32 %v1337_v28, %v559_v34  ;;  %781 = vst [vmem:[%s1250_s30 + $0x1b0] sm:$0x1] %v774_v16 }
  0xc6   : > { %v764_v32 = vadd.f32 %v1324_v19, %v677_v30  ;;  %v733_v37 = vadd.f32 %v1337_v28, %v599_v35  ;;  %782 = vst [vmem:[%s1250_s30 + $0x1f8] sm:$0x1] %v774_v16 }
  0xc7   : > { %821 = vst [vmem:[%s1250_s30 + $0x151] sm:$0xff] %v748_v31 }
  0xc8   : > { %837 = vst [vmem:[%s1250_s30 + $0x1e1] sm:$0xff] %v764_v32 }
  0xc9   : > { %790 = vst [vmem:[%s1250_s30 + $0x39] sm:$0xff] %v717_v36 }
  0xca   : > { %806 = vst [vmem:[%s1250_s30 + $0xc9] sm:$0xff] %v733_v37 }
  0xcc   : > { %v639_v39 = vpop.f32.mrf.mxu2  ;;  %v562_v43 = vpop.f32.mrf.mxu0 }
  0xcd   : > { %v679_v40 = vpop.f32.mrf.mxu3  ;;  %v749_v41 = vadd.f32 %v1337_v28, %v639_v39  ;;  %v602_v44 = vpop.f32.mrf.mxu1  ;;  %v718_v45 = vadd.f32 %v1245_v33, %v562_v43 }
  0xce   : > { %v765_v42 = vadd.f32 %v1337_v28, %v679_v40  ;;  %v734_v46 = vadd.f32 %v1245_v33, %v602_v44 }
  0xcf   : > { %822 = vst [vmem:[%s1250_s30 + $0x159] sm:$0xff] %v749_v41 }
  0xd0   : > { %838 = vst [vmem:[%s1250_s30 + $0x1e9] sm:$0xff] %v765_v42 }
  0xd1   : > { %791 = vst [vmem:[%s1250_s30 + $0x49] sm:$0xff] %v718_v45 }
  0xd2   : > { %807 = vst [vmem:[%s1250_s30 + $0xd9] sm:$0xff] %v734_v46 }
  0xd4   : > { %v642_v48 = vpop.f32.mrf.mxu2  ;;  %v564_v52 = vpop.f32.mrf.mxu0 }
  0xd5   : > { %v682_v49 = vpop.f32.mrf.mxu3  ;;  %v750_v50 = vadd.f32 %v1245_v33, %v642_v48  ;;  %v604_v53 = vpop.f32.mrf.mxu1  ;;  %v719_v54 = vadd.f32 %v1259_v38, %v564_v52 }
  0xd6   : > { %v766_v51 = vadd.f32 %v1245_v33, %v682_v49  ;;  %v735_v55 = vadd.f32 %v1259_v38, %v604_v53 }
  0xd7   : > { %823 = vst [vmem:[%s1250_s30 + $0x169] sm:$0xff] %v750_v50 }
  0xd8   : > { %839 = vst [vmem:[%s1250_s30 + $0x1f9] sm:$0xff] %v766_v51 }
  0xd9   : > { %792 = vst [vmem:[%s1250_s30 + $0x51] sm:$0xff] %v719_v54 }
  0xda   : > { %808 = vst [vmem:[%s1250_s30 + $0xe1] sm:$0xff] %v735_v55 }
  0xdc   : > { %v644_v57 = vpop.f32.mrf.mxu2  ;;  %v567_v60 = vpop.f32.mrf.mxu0 }
  0xdd   : > { %v684_v58 = vpop.f32.mrf.mxu3  ;;  %v751_v59 = vadd.f32 %v1259_v38, %v644_v57  ;;  %v607_v61 = vpop.f32.mrf.mxu1  ;;  %v720_v62 = vadd.f32 %v1272_v47, %v567_v60 }
  0xde   : > { %v767_v33 = vadd.f32 %v1259_v38, %v684_v58  ;;  %v736_v63 = vadd.f32 %v1272_v47, %v607_v61 }
  0xdf   : > { %824 = vst [vmem:[%s1250_s30 + $0x171] sm:$0xff] %v751_v59 }
  0xe0   : > { %840 = vst [vmem:[%s1250_s30 + $0x201] sm:$0xff] %v767_v33 }
  0xe1   : > { %793 = vst [vmem:[%s1250_s30 + $0x59] sm:$0xff] %v720_v62 }
  0xe2   : > { %809 = vst [vmem:[%s1250_s30 + $0xe9] sm:$0xff] %v736_v63 }
  0xe4   : > { %v647_v0 = vpop.f32.mrf.mxu2  ;;  %v569_v4 = vpop.f32.mrf.mxu0 }
  0xe5   : > { %v687_v2 = vpop.f32.mrf.mxu3  ;;  %v752_v3 = vadd.f32 %v1272_v47, %v647_v0  ;;  %v609_v5 = vpop.f32.mrf.mxu1  ;;  %v721_v6 = vadd.f32 %v1285_v56, %v569_v4 }
  0xe6   : > { %v768_v38 = vadd.f32 %v1272_v47, %v687_v2  ;;  %v737_v7 = vadd.f32 %v1285_v56, %v609_v5 }
  0xe7   : > { %825 = vst [vmem:[%s1250_s30 + $0x179] sm:$0xff] %v752_v3 }
  0xe8   : > { %841 = vst [vmem:[%s1250_s30 + $0x209] sm:$0xff] %v768_v38 }
  0xe9   : > { %794 = vst [vmem:[%s1250_s30 + $0x61] sm:$0xff] %v721_v6 }
  0xea   : > { %810 = vst [vmem:[%s1250_s30 + $0xf1] sm:$0xff] %v737_v7 }
  0xec   : > { %v649_v8 = vpop.f32.mrf.mxu2  ;;  %v572_v12 = vpop.f32.mrf.mxu0 }
  0xed   : > { %v689_v9 = vpop.f32.mrf.mxu3  ;;  %v753_v47 = vadd.f32 %v1285_v56, %v649_v8  ;;  %v612_v13 = vpop.f32.mrf.mxu1  ;;  %v722_v14 = vadd.f32 %v1298_v1, %v572_v12 }
  0xee   : > { %v769_v11 = vadd.f32 %v1285_v56, %v689_v9  ;;  %v738_v15 = vadd.f32 %v1298_v1, %v612_v13 }
  0xef   : > { %826 = vst [vmem:[%s1250_s30 + $0x181] sm:$0xff] %v753_v47 }
  0xf0   : > { %842 = vst [vmem:[%s1250_s30 + $0x211] sm:$0xff] %v769_v11 }
  0xf1   : > { %795 = vst [vmem:[%s1250_s30 + $0x69] sm:$0xff] %v722_v14 }
  0xf2   : > { %811 = vst [vmem:[%s1250_s30 + $0xf9] sm:$0xff] %v738_v15 }
  0xf4   : > { %v652_v56 = vpop.f32.mrf.mxu2  ;;  %v574_v21 = vpop.f32.mrf.mxu0 }
  0xf5   : > { %v692_v17 = vpop.f32.mrf.mxu3  ;;  %v754_v18 = vadd.f32 %v1298_v1, %v652_v56  ;;  %v614_v22 = vpop.f32.mrf.mxu1  ;;  %v723_v23 = vadd.f32 %v1311_v10, %v574_v21 }
  0xf6   : > { %v770_v20 = vadd.f32 %v1298_v1, %v692_v17  ;;  %v739_v24 = vadd.f32 %v1311_v10, %v614_v22 }
  0xf7   : > { %827 = vst [vmem:[%s1250_s30 + $0x189] sm:$0xff] %v754_v18 }
  0xf8   : > { %843 = vst [vmem:[%s1250_s30 + $0x219] sm:$0xff] %v770_v20 }
  0xf9   : > { %796 = vst [vmem:[%s1250_s30 + $0x71] sm:$0xff] %v723_v23 }
  0xfa   : > { %812 = vst [vmem:[%s1250_s30 + $0x101] sm:$0xff] %v739_v24 }
  0xfc   : > { %v654_v1 = vpop.f32.mrf.mxu2  ;;  %v577_v29 = vpop.f32.mrf.mxu0 }
  0xfd   : > { %v694_v25 = vpop.f32.mrf.mxu3  ;;  %v755_v26 = vadd.f32 %v1311_v10, %v654_v1  ;;  %v617_v30 = vpop.f32.mrf.mxu1  ;;  %v724_v31 = vadd.f32 %v1324_v19, %v577_v29 }
  0xfe   : > { %v771_v27 = vadd.f32 %v1311_v10, %v694_v25  ;;  %v740_v32 = vadd.f32 %v1324_v19, %v617_v30 }
  0xff   : > { %828 = vst [vmem:[%s1250_s30 + $0x191] sm:$0xff] %v755_v26 }
 0x100   : > { %844 = vst [vmem:[%s1250_s30 + $0x221] sm:$0xff] %v771_v27 }
 0x101   : > { %797 = vst [vmem:[%s1250_s30 + $0x79] sm:$0xff] %v724_v31 }
 0x102   : > { %813 = vst [vmem:[%s1250_s30 + $0x109] sm:$0xff] %v740_v32 }
 0x104   : > { %v657_v34 = vpop.f32.mrf.mxu2  ;;  %v579_v37 = vpop.f32.mrf.mxu0 }
 0x105   : > { %v697_v35 = vpop.f32.mrf.mxu3  ;;  %v756_v10 = vadd.f32 %v1324_v19, %v657_v34  ;;  %v619_v39 = vpop.f32.mrf.mxu1  ;;  %v725_v40 = vadd.f32 %v1337_v28, %v579_v37 }
 0x106   : > { %v772_v36 = vadd.f32 %v1324_v19, %v697_v35  ;;  %v741_v41 = vadd.f32 %v1337_v28, %v619_v39 }
 0x107   : > { %829 = vst [vmem:[%s1250_s30 + $0x199] sm:$0xff] %v756_v10 }
 0x108   : > { %845 = vst [vmem:[%s1250_s30 + $0x229] sm:$0xff] %v772_v36 }
 0x109   : > { %798 = vst [vmem:[%s1250_s30 + $0x81] sm:$0xff] %v725_v40 }
 0x10a   : > { %814 = vst [vmem:[%s1250_s30 + $0x111] sm:$0xff] %v741_v41 }
 0x10c   : > { %v659_v42 = vpop.f32.mrf.mxu2 }
 0x10d   : > { %v699_v43 = vpop.f32.mrf.mxu3  ;;  %v757_v44 = vadd.f32 %v1337_v28, %v659_v42 }
 0x10e   : > { %v773_v45 = vadd.f32 %v1337_v28, %v699_v43 }
 0x10f   : > { %830 = vst [vmem:[%s1250_s30 + $0x1a1] sm:$0xff] %v757_v44 }
 0x110   : > { %846 = vst [vmem:[%s1250_s30 + $0x231] sm:$0xff] %v773_v45 }
 0x111 PF: > { %s14_s15 = sadd.s32 1, %s1131_s15  }
 0x112   : > { %p11_p5 = scmp.ge.s32.totalorder %s14_s15, 4  }
 0x114   :  { %13 = sbr.rel (!%p11_p5) target bundleno = 1 (0x1), region = 66 }

</bundles_post_ra>
